<compile_context>
chip_gen: v7x
topology: tpu7x:2x2x1
jax: 0.10.0
libtpu: 0.0.40
codegen_flags: <defaults>
</compile_context>

<pallas_src>
import functools

import jax
import jax.numpy as jnp
from jax.experimental import pallas as pl
from jax.experimental.pallas import tpu as pltpu


def _layer_kernel(x_ref, bias_ref,
                  g1_ref, b1_ref, wqkv_ref, bqkv_ref, wproj_ref, bproj_ref,
                  g2_ref, b2_ref, w1_ref, bm1_ref, w2_ref, bm2_ref,
                  o_ref, *, batch, seq, heads, head_dim, eps):
    """One TransformerLayerClip block over the full (B, S, W) batch.

    Weight layout convention (synthetic params, fixed by init_layer_params):
      wqkv columns = [Q | K | V], each W wide, heads contiguous (head-major).
      wproj rows   = head-major context features.
    """
    B, S, H, D = batch, seq, heads, head_dim
    W = H * D

    x = x_ref[...].reshape(B * S, W)               # (B*S, W) f32, fills MXU M dim

    def layernorm(h, g_ref, b_ref):
        mu = jnp.mean(h, axis=-1, keepdims=True)
        var = jnp.mean((h - mu) ** 2, axis=-1, keepdims=True)
        return (h - mu) * jax.lax.rsqrt(var + eps) * g_ref[0] + b_ref[0]

    # ---------------- self attention ----------------
    h1 = layernorm(x, g1_ref, b1_ref)
    qkv = jnp.dot(h1.astype(jnp.bfloat16), wqkv_ref[...],
                  preferred_element_type=jnp.float32) + bqkv_ref[0]    # (B*S, 3W) f32

    scale = 1.0 / (D ** 0.5)
    q = qkv[:, 0 * W:1 * W] * scale                # scale applied once, on (B*S, W)
    k = qkv[:, 1 * W:2 * W]
    v = qkv[:, 2 * W:3 * W]

    # Reassemble heads into a single leading batch dim: (H*B, S, D).
    def to_hb(t):
        parts = [t[:, hh * D:(hh + 1) * D].reshape(B, S, D) for hh in range(H)]
        return jnp.concatenate(parts, axis=0).astype(jnp.bfloat16)

    qh, kh, vh = to_hb(q), to_hb(k), to_hb(v)

    # Batched QK^T over all heads & batches at once (no k.T, no head loop).
    scores = jnp.einsum('bqd,bkd->bqk', qh, kh,
                        preferred_element_type=jnp.float32)            # (H*B, S, S) f32
    scores = scores + bias_ref[...][None, :, :]    # additive mask bias

    m = jnp.max(scores, axis=-1, keepdims=True)
    p = jnp.exp(scores - m)
    denom = jnp.sum(p, axis=-1, keepdims=True)
    p = p * pl.reciprocal(denom, approx=True)      # EUP reciprocal, VALU stays free

    ctx = jnp.einsum('bqk,bkd->bqd', p.astype(jnp.bfloat16), vh,
                     preferred_element_type=jnp.float32)               # (H*B, S, D)

    # Back to (B*S, W) with head-major columns for the output projection.
    ctx2 = jnp.concatenate(
        [ctx[hh * B:(hh + 1) * B].reshape(B * S, D) for hh in range(H)], axis=-1)

    attn_out = jnp.dot(ctx2.astype(jnp.bfloat16), wproj_ref[...],
                       preferred_element_type=jnp.float32) + bproj_ref[0]
    res1 = x + attn_out                            # residual (dropout/droppath prob = 0)

    # ---------------- MLP with quick_gelu ----------------
    h2 = layernorm(res1, g2_ref, b2_ref)
    f1 = jnp.dot(h2.astype(jnp.bfloat16), w1_ref[...],
                 preferred_element_type=jnp.float32) + bm1_ref[0]
    f1 = f1 * jax.nn.sigmoid(1.702 * f1)           # quick_gelu (EUP sigmoid)
    f2 = jnp.dot(f1.astype(jnp.bfloat16), w2_ref[...],
                 preferred_element_type=jnp.float32) + bm2_ref[0]

    o_ref[...] = (res1 + f2).reshape(B, S, W)      # single lane-dense store


def transformer_layer(x, bias, params, *, heads, eps=1e-5):
    """Apply one transformer block as a single fused pallas_call."""
    B, S, W = x.shape
    head_dim = W // heads
    ffn = 4 * W

    kernel = functools.partial(_layer_kernel, batch=B, seq=S, heads=heads,
                               head_dim=head_dim, eps=eps)

    # Rough per-layer cost (advisory only).
    flops = 2 * B * S * W * (3 * W + W + 8 * W) + 4 * B * heads * S * S * head_dim
    transcendentals = B * heads * S * S + B * S * ffn
    bytes_accessed = (2 * B * S * W * 4                       # x in / out (f32)
                      + (3 * W * W + W * W + 2 * W * ffn) * 2  # bf16 weights
                      + (6 * W + ffn) * 4 + S * S * 4)         # biases/LN/mask (f32)

    return pl.pallas_call(
        kernel,
        out_shape=jax.ShapeDtypeStruct((B, S, W), jnp.float32),
        compiler_params=pltpu.CompilerParams(vmem_limit_bytes=32 * 1024 * 1024),
        cost_estimate=pl.CostEstimate(flops=int(flops),
                                      transcendentals=int(transcendentals),
                                      bytes_accessed=int(bytes_accessed)),
    )(x, bias, *params)


def init_layer_params(key, width):
    """Deterministic synthetic params for one TransformerLayerClip.

    Matmul weights are stored in bfloat16 (MXU-native); LayerNorm params and
    biases stay in float32 (they feed the f32 accumulators / VPU math).
    """
    ffn = 4 * width
    ks = jax.random.split(key, 4)

    def xavier_bf16(k, fan_in, fan_out):
        std = (2.0 / (fan_in + fan_out)) ** 0.5
        w = std * jax.random.normal(k, (fan_in, fan_out), jnp.float32)
        return w.astype(jnp.bfloat16)

    g1 = jnp.ones((1, width), jnp.float32)
    b1 = jnp.zeros((1, width), jnp.float32)
    wqkv = xavier_bf16(ks[0], width, 3 * width)   # columns [Q | K | V], head-major
    bqkv = jnp.zeros((1, 3 * width), jnp.float32)
    wproj = xavier_bf16(ks[1], width, width)      # rows head-major
    bproj = jnp.zeros((1, width), jnp.float32)
    g2 = jnp.ones((1, width), jnp.float32)
    b2 = jnp.zeros((1, width), jnp.float32)
    w1 = xavier_bf16(ks[2], width, ffn)
    bm1 = jnp.zeros((1, ffn), jnp.float32)
    w2 = xavier_bf16(ks[3], ffn, width)
    bm2 = jnp.zeros((1, width), jnp.float32)
    return (g1, b1, wqkv, bqkv, wproj, bproj, g2, b2, w1, bm1, w2, bm2)


def transformer_forward(x, attn_mask, all_params, *, heads):
    """CLIP Transformer.forward: sequentially apply all residual blocks."""
    B, S, W = x.shape
    if attn_mask is None:
        bias = jnp.zeros((S, S), jnp.float32)            # no mask -> zero bias
    else:
        keep = attn_mask.astype(jnp.float32)             # 1 = attend, 0 = masked
        bias = -10000.0 * (1.0 - keep)                   # additive bias, computed once
    for params in all_params:
        x = transformer_layer(x, bias, params, heads=heads)
    return x


if __name__ == "__main__":
    # Small shapes consistent with the module: width=32, layers=2, heads=4.
    width, layers, heads = 32, 2, 4
    batch, seq = 2, 8

    key = jax.random.PRNGKey(0)
    k_x, k_p = jax.random.split(key)

    x = jax.random.normal(k_x, (batch, seq, width), jnp.float32)

    # Causal keep-mask (1 = attend), matching CLIP's text-transformer masking.
    attn_mask = jnp.tril(jnp.ones((seq, seq), jnp.float32))

    layer_keys = jax.random.split(k_p, layers)
    all_params = [init_layer_params(layer_keys[i], width) for i in range(layers)]

    out = transformer_forward(x, attn_mask, all_params, heads=heads)
    out = jax.block_until_ready(out)
    assert out.shape == (batch, seq, width)
    assert bool(jnp.all(jnp.isfinite(out)))
    print("KERNEL_OK")
</pallas_src>

<mosaic_0001>
module attributes {stable_mosaic.version = 11 : i64} {
  func.func @_layer_kernel(%arg0: memref<2x8x32xf32, #tpu.memory_space<vmem>>, %arg1: memref<8x8xf32, #tpu.memory_space<vmem>>, %arg2: memref<1x32xf32, #tpu.memory_space<vmem>>, %arg3: memref<1x32xf32, #tpu.memory_space<vmem>>, %arg4: memref<32x96xbf16, #tpu.memory_space<vmem>>, %arg5: memref<1x96xf32, #tpu.memory_space<vmem>>, %arg6: memref<32x32xbf16, #tpu.memory_space<vmem>>, %arg7: memref<1x32xf32, #tpu.memory_space<vmem>>, %arg8: memref<1x32xf32, #tpu.memory_space<vmem>>, %arg9: memref<1x32xf32, #tpu.memory_space<vmem>>, %arg10: memref<32x128xbf16, #tpu.memory_space<vmem>>, %arg11: memref<1x128xf32, #tpu.memory_space<vmem>>, %arg12: memref<128x32xbf16, #tpu.memory_space<vmem>>, %arg13: memref<1x32xf32, #tpu.memory_space<vmem>>, %arg14: memref<2x8x32xf32, #tpu.memory_space<vmem>>) attributes {dimension_semantics = [], scalar_prefetch = 0 : i64, scratch_operands = 0 : i64, tpu.core_type = #tpu.core_type<tc>} {
    %c0 = arith.constant 0 : index
    %c0_0 = arith.constant 0 : index
    %c0_1 = arith.constant 0 : index
    %0 = vector.load %arg0[%c0, %c0_0, %c0_1] : memref<2x8x32xf32, #tpu.memory_space<vmem>>, vector<2x8x32xf32>
    %1 = vector.shape_cast %0 : vector<2x8x32xf32> to vector<16x32xf32>
    %cst = arith.constant dense<0.000000e+00> : vector<16xf32>
    %2 = vector.multi_reduction <add>, %1, %cst [1] : vector<16x32xf32> to vector<16xf32>
    %3 = vector.shape_cast %2 : vector<16xf32> to vector<16x1xf32>
    %cst_2 = arith.constant 3.200000e+01 : f32
    %4 = vector.broadcast %cst_2 : f32 to vector<16x1xf32>
    %5 = arith.divf %3, %4 : vector<16x1xf32>
    %6 = vector.broadcast %5 : vector<16x1xf32> to vector<16x32xf32>
    %7 = arith.subf %1, %6 : vector<16x32xf32>
    %8 = arith.mulf %7, %7 : vector<16x32xf32>
    %cst_3 = arith.constant dense<0.000000e+00> : vector<16xf32>
    %9 = vector.multi_reduction <add>, %8, %cst_3 [1] : vector<16x32xf32> to vector<16xf32>
    %10 = vector.shape_cast %9 : vector<16xf32> to vector<16x1xf32>
    %cst_4 = arith.constant 3.200000e+01 : f32
    %11 = vector.broadcast %cst_4 : f32 to vector<16x1xf32>
    %12 = arith.divf %10, %11 : vector<16x1xf32>
    %13 = vector.broadcast %5 : vector<16x1xf32> to vector<16x32xf32>
    %14 = arith.subf %1, %13 : vector<16x32xf32>
    %cst_5 = arith.constant 9.99999974E-6 : f32
    %15 = vector.broadcast %cst_5 : f32 to vector<16x1xf32>
    %16 = arith.addf %12, %15 : vector<16x1xf32>
    %17 = math.rsqrt %16 : vector<16x1xf32>
    %18 = vector.broadcast %17 : vector<16x1xf32> to vector<16x32xf32>
    %19 = arith.mulf %14, %18 : vector<16x32xf32>
    %c0_6 = arith.constant 0 : index
    %c0_7 = arith.constant 0 : index
    %20 = vector.load %arg2[%c0_6, %c0_7] : memref<1x32xf32, #tpu.memory_space<vmem>>, vector<1x32xf32>
    %21 = vector.shape_cast %20 : vector<1x32xf32> to vector<32xf32>
    %22 = vector.shape_cast %21 : vector<32xf32> to vector<1x32xf32>
    %23 = vector.broadcast %22 : vector<1x32xf32> to vector<16x32xf32>
    %24 = arith.mulf %19, %23 : vector<16x32xf32>
    %c0_8 = arith.constant 0 : index
    %c0_9 = arith.constant 0 : index
    %25 = vector.load %arg3[%c0_8, %c0_9] : memref<1x32xf32, #tpu.memory_space<vmem>>, vector<1x32xf32>
    %26 = vector.shape_cast %25 : vector<1x32xf32> to vector<32xf32>
    %27 = vector.shape_cast %26 : vector<32xf32> to vector<1x32xf32>
    %28 = vector.broadcast %27 : vector<1x32xf32> to vector<16x32xf32>
    %29 = arith.addf %24, %28 : vector<16x32xf32>
    %30 = arith.truncf %29 : vector<16x32xf32> to vector<16x32xbf16>
    %c0_10 = arith.constant 0 : index
    %c0_11 = arith.constant 0 : index
    %31 = vector.load %arg4[%c0_10, %c0_11] : memref<32x96xbf16, #tpu.memory_space<vmem>>, vector<32x96xbf16>
    %cst_12 = arith.constant dense<0.000000e+00> : vector<16x96xf32>
    %32 = tpu.matmul %30, %31, %cst_12 {dimension_numbers = #tpu.dot_dimension_numbers<[1], [0], [0], [1], [0, 0, 1, 1], [], []>} : vector<16x32xbf16>, vector<32x96xbf16>, vector<16x96xf32> -> vector<16x96xf32>
    %c0_13 = arith.constant 0 : index
    %c0_14 = arith.constant 0 : index
    %33 = vector.load %arg5[%c0_13, %c0_14] : memref<1x96xf32, #tpu.memory_space<vmem>>, vector<1x96xf32>
    %34 = vector.shape_cast %33 : vector<1x96xf32> to vector<96xf32>
    %35 = vector.shape_cast %34 : vector<96xf32> to vector<1x96xf32>
    %36 = vector.broadcast %35 : vector<1x96xf32> to vector<16x96xf32>
    %37 = arith.addf %32, %36 : vector<16x96xf32>
    %38 = vector.extract_strided_slice %37 {offsets = [0, 0], sizes = [16, 32], strides = [1, 1]} : vector<16x96xf32> to vector<16x32xf32>
    %cst_15 = arith.constant 0.353553385 : f32
    %39 = vector.broadcast %cst_15 : f32 to vector<16x32xf32>
    %40 = arith.mulf %38, %39 : vector<16x32xf32>
    %41 = vector.extract_strided_slice %37 {offsets = [0, 32], sizes = [16, 32], strides = [1, 1]} : vector<16x96xf32> to vector<16x32xf32>
    %42 = vector.extract_strided_slice %37 {offsets = [0, 64], sizes = [16, 32], strides = [1, 1]} : vector<16x96xf32> to vector<16x32xf32>
    %43 = vector.extract_strided_slice %40 {offsets = [0, 0], sizes = [16, 8], strides = [1, 1]} : vector<16x32xf32> to vector<16x8xf32>
    %44 = vector.shape_cast %43 : vector<16x8xf32> to vector<2x8x8xf32>
    %45 = vector.extract_strided_slice %40 {offsets = [0, 8], sizes = [16, 8], strides = [1, 1]} : vector<16x32xf32> to vector<16x8xf32>
    %46 = vector.shape_cast %45 : vector<16x8xf32> to vector<2x8x8xf32>
    %47 = vector.extract_strided_slice %40 {offsets = [0, 16], sizes = [16, 8], strides = [1, 1]} : vector<16x32xf32> to vector<16x8xf32>
    %48 = vector.shape_cast %47 : vector<16x8xf32> to vector<2x8x8xf32>
    %49 = vector.extract_strided_slice %40 {offsets = [0, 24], sizes = [16, 8], strides = [1, 1]} : vector<16x32xf32> to vector<16x8xf32>
    %50 = vector.shape_cast %49 : vector<16x8xf32> to vector<2x8x8xf32>
    %51 = tpu.concatenate %44, %46, %48, %50 in 0 : vector<2x8x8xf32>, vector<2x8x8xf32>, vector<2x8x8xf32>, vector<2x8x8xf32> -> vector<8x8x8xf32>
    %52 = arith.truncf %51 : vector<8x8x8xf32> to vector<8x8x8xbf16>
    %53 = vector.extract_strided_slice %41 {offsets = [0, 0], sizes = [16, 8], strides = [1, 1]} : vector<16x32xf32> to vector<16x8xf32>
    %54 = vector.shape_cast %53 : vector<16x8xf32> to vector<2x8x8xf32>
    %55 = vector.extract_strided_slice %41 {offsets = [0, 8], sizes = [16, 8], strides = [1, 1]} : vector<16x32xf32> to vector<16x8xf32>
    %56 = vector.shape_cast %55 : vector<16x8xf32> to vector<2x8x8xf32>
    %57 = vector.extract_strided_slice %41 {offsets = [0, 16], sizes = [16, 8], strides = [1, 1]} : vector<16x32xf32> to vector<16x8xf32>
    %58 = vector.shape_cast %57 : vector<16x8xf32> to vector<2x8x8xf32>
    %59 = vector.extract_strided_slice %41 {offsets = [0, 24], sizes = [16, 8], strides = [1, 1]} : vector<16x32xf32> to vector<16x8xf32>
    %60 = vector.shape_cast %59 : vector<16x8xf32> to vector<2x8x8xf32>
    %61 = tpu.concatenate %54, %56, %58, %60 in 0 : vector<2x8x8xf32>, vector<2x8x8xf32>, vector<2x8x8xf32>, vector<2x8x8xf32> -> vector<8x8x8xf32>
    %62 = arith.truncf %61 : vector<8x8x8xf32> to vector<8x8x8xbf16>
    %63 = vector.extract_strided_slice %42 {offsets = [0, 0], sizes = [16, 8], strides = [1, 1]} : vector<16x32xf32> to vector<16x8xf32>
    %64 = vector.shape_cast %63 : vector<16x8xf32> to vector<2x8x8xf32>
    %65 = vector.extract_strided_slice %42 {offsets = [0, 8], sizes = [16, 8], strides = [1, 1]} : vector<16x32xf32> to vector<16x8xf32>
    %66 = vector.shape_cast %65 : vector<16x8xf32> to vector<2x8x8xf32>
    %67 = vector.extract_strided_slice %42 {offsets = [0, 16], sizes = [16, 8], strides = [1, 1]} : vector<16x32xf32> to vector<16x8xf32>
    %68 = vector.shape_cast %67 : vector<16x8xf32> to vector<2x8x8xf32>
    %69 = vector.extract_strided_slice %42 {offsets = [0, 24], sizes = [16, 8], strides = [1, 1]} : vector<16x32xf32> to vector<16x8xf32>
    %70 = vector.shape_cast %69 : vector<16x8xf32> to vector<2x8x8xf32>
    %71 = tpu.concatenate %64, %66, %68, %70 in 0 : vector<2x8x8xf32>, vector<2x8x8xf32>, vector<2x8x8xf32>, vector<2x8x8xf32> -> vector<8x8x8xf32>
    %72 = arith.truncf %71 : vector<8x8x8xf32> to vector<8x8x8xbf16>
    "tpu.trace_start"() <{level = 10 : i32, message = "bqd,bkd->bqk"}> : () -> ()
    %cst_16 = arith.constant dense<0.000000e+00> : vector<8x8x8xf32>
    %73 = tpu.matmul %52, %62, %cst_16 {dimension_numbers = #tpu.dot_dimension_numbers<[2], [2], [1], [1], [0, 0, 0, 1, 1, 1], [0], [0]>} : vector<8x8x8xbf16>, vector<8x8x8xbf16>, vector<8x8x8xf32> -> vector<8x8x8xf32>
    "tpu.trace_stop"() : () -> ()
    %c0_17 = arith.constant 0 : index
    %c0_18 = arith.constant 0 : index
    %74 = vector.load %arg1[%c0_17, %c0_18] : memref<8x8xf32, #tpu.memory_space<vmem>>, vector<8x8xf32>
    %75 = vector.shape_cast %74 : vector<8x8xf32> to vector<1x8x8xf32>
    %76 = vector.broadcast %75 : vector<1x8x8xf32> to vector<8x8x8xf32>
    %77 = arith.addf %73, %76 : vector<8x8x8xf32>
    %cst_19 = arith.constant dense<0xFF800000> : vector<8x8xf32>
    %78 = vector.multi_reduction <maximumf>, %77, %cst_19 [2] : vector<8x8x8xf32> to vector<8x8xf32>
    %79 = vector.shape_cast %78 : vector<8x8xf32> to vector<8x8x1xf32>
    %80 = vector.broadcast %79 : vector<8x8x1xf32> to vector<8x8x8xf32>
    %81 = arith.subf %77, %80 : vector<8x8x8xf32>
    %82 = math.exp %81 : vector<8x8x8xf32>
    %cst_20 = arith.constant dense<0.000000e+00> : vector<8x8xf32>
    %83 = vector.multi_reduction <add>, %82, %cst_20 [2] : vector<8x8x8xf32> to vector<8x8xf32>
    %84 = vector.shape_cast %83 : vector<8x8xf32> to vector<8x8x1xf32>
    %85 = tpu.reciprocal %84 {approx = true} : vector<8x8x1xf32> -> vector<8x8x1xf32>
    %86 = vector.broadcast %85 : vector<8x8x1xf32> to vector<8x8x8xf32>
    %87 = arith.mulf %82, %86 : vector<8x8x8xf32>
    %88 = arith.truncf %87 : vector<8x8x8xf32> to vector<8x8x8xbf16>
    "tpu.trace_start"() <{level = 10 : i32, message = "bqk,bkd->bqd"}> : () -> ()
    %cst_21 = arith.constant dense<0.000000e+00> : vector<8x8x8xf32>
    %89 = tpu.matmul %88, %72, %cst_21 {dimension_numbers = #tpu.dot_dimension_numbers<[2], [1], [1], [2], [0, 0, 0, 1, 1, 2], [0], [0]>} : vector<8x8x8xbf16>, vector<8x8x8xbf16>, vector<8x8x8xf32> -> vector<8x8x8xf32>
    "tpu.trace_stop"() : () -> ()
    %90 = vector.extract_strided_slice %89 {offsets = [0, 0, 0], sizes = [2, 8, 8], strides = [1, 1, 1]} : vector<8x8x8xf32> to vector<2x8x8xf32>
    %91 = vector.shape_cast %90 : vector<2x8x8xf32> to vector<16x8xf32>
    %92 = vector.extract_strided_slice %89 {offsets = [2, 0, 0], sizes = [2, 8, 8], strides = [1, 1, 1]} : vector<8x8x8xf32> to vector<2x8x8xf32>
    %93 = vector.shape_cast %92 : vector<2x8x8xf32> to vector<16x8xf32>
    %94 = vector.extract_strided_slice %89 {offsets = [4, 0, 0], sizes = [2, 8, 8], strides = [1, 1, 1]} : vector<8x8x8xf32> to vector<2x8x8xf32>
    %95 = vector.shape_cast %94 : vector<2x8x8xf32> to vector<16x8xf32>
    %96 = vector.extract_strided_slice %89 {offsets = [6, 0, 0], sizes = [2, 8, 8], strides = [1, 1, 1]} : vector<8x8x8xf32> to vector<2x8x8xf32>
    %97 = vector.shape_cast %96 : vector<2x8x8xf32> to vector<16x8xf32>
    %98 = tpu.concatenate %91, %93, %95, %97 in 1 : vector<16x8xf32>, vector<16x8xf32>, vector<16x8xf32>, vector<16x8xf32> -> vector<16x32xf32>
    %99 = arith.truncf %98 : vector<16x32xf32> to vector<16x32xbf16>
    %c0_22 = arith.constant 0 : index
    %c0_23 = arith.constant 0 : index
    %100 = vector.load %arg6[%c0_22, %c0_23] : memref<32x32xbf16, #tpu.memory_space<vmem>>, vector<32x32xbf16>
    %cst_24 = arith.constant dense<0.000000e+00> : vector<16x32xf32>
    %101 = tpu.matmul %99, %100, %cst_24 {dimension_numbers = #tpu.dot_dimension_numbers<[1], [0], [0], [1], [0, 0, 1, 1], [], []>} : vector<16x32xbf16>, vector<32x32xbf16>, vector<16x32xf32> -> vector<16x32xf32>
    %c0_25 = arith.constant 0 : index
    %c0_26 = arith.constant 0 : index
    %102 = vector.load %arg7[%c0_25, %c0_26] : memref<1x32xf32, #tpu.memory_space<vmem>>, vector<1x32xf32>
    %103 = vector.shape_cast %102 : vector<1x32xf32> to vector<32xf32>
    %104 = vector.shape_cast %103 : vector<32xf32> to vector<1x32xf32>
    %105 = vector.broadcast %104 : vector<1x32xf32> to vector<16x32xf32>
    %106 = arith.addf %101, %105 : vector<16x32xf32>
    %107 = arith.addf %1, %106 : vector<16x32xf32>
    %cst_27 = arith.constant dense<0.000000e+00> : vector<16xf32>
    %108 = vector.multi_reduction <add>, %107, %cst_27 [1] : vector<16x32xf32> to vector<16xf32>
    %109 = vector.shape_cast %108 : vector<16xf32> to vector<16x1xf32>
    %cst_28 = arith.constant 3.200000e+01 : f32
    %110 = vector.broadcast %cst_28 : f32 to vector<16x1xf32>
    %111 = arith.divf %109, %110 : vector<16x1xf32>
    %112 = vector.broadcast %111 : vector<16x1xf32> to vector<16x32xf32>
    %113 = arith.subf %107, %112 : vector<16x32xf32>
    %114 = arith.mulf %113, %113 : vector<16x32xf32>
    %cst_29 = arith.constant dense<0.000000e+00> : vector<16xf32>
    %115 = vector.multi_reduction <add>, %114, %cst_29 [1] : vector<16x32xf32> to vector<16xf32>
    %116 = vector.shape_cast %115 : vector<16xf32> to vector<16x1xf32>
    %cst_30 = arith.constant 3.200000e+01 : f32
    %117 = vector.broadcast %cst_30 : f32 to vector<16x1xf32>
    %118 = arith.divf %116, %117 : vector<16x1xf32>
    %119 = vector.broadcast %111 : vector<16x1xf32> to vector<16x32xf32>
    %120 = arith.subf %107, %119 : vector<16x32xf32>
    %cst_31 = arith.constant 9.99999974E-6 : f32
    %121 = vector.broadcast %cst_31 : f32 to vector<16x1xf32>
    %122 = arith.addf %118, %121 : vector<16x1xf32>
    %123 = math.rsqrt %122 : vector<16x1xf32>
    %124 = vector.broadcast %123 : vector<16x1xf32> to vector<16x32xf32>
    %125 = arith.mulf %120, %124 : vector<16x32xf32>
    %c0_32 = arith.constant 0 : index
    %c0_33 = arith.constant 0 : index
    %126 = vector.load %arg8[%c0_32, %c0_33] : memref<1x32xf32, #tpu.memory_space<vmem>>, vector<1x32xf32>
    %127 = vector.shape_cast %126 : vector<1x32xf32> to vector<32xf32>
    %128 = vector.shape_cast %127 : vector<32xf32> to vector<1x32xf32>
    %129 = vector.broadcast %128 : vector<1x32xf32> to vector<16x32xf32>
    %130 = arith.mulf %125, %129 : vector<16x32xf32>
    %c0_34 = arith.constant 0 : index
    %c0_35 = arith.constant 0 : index
    %131 = vector.load %arg9[%c0_34, %c0_35] : memref<1x32xf32, #tpu.memory_space<vmem>>, vector<1x32xf32>
    %132 = vector.shape_cast %131 : vector<1x32xf32> to vector<32xf32>
    %133 = vector.shape_cast %132 : vector<32xf32> to vector<1x32xf32>
    %134 = vector.broadcast %133 : vector<1x32xf32> to vector<16x32xf32>
    %135 = arith.addf %130, %134 : vector<16x32xf32>
    %136 = arith.truncf %135 : vector<16x32xf32> to vector<16x32xbf16>
    %c0_36 = arith.constant 0 : index
    %c0_37 = arith.constant 0 : index
    %137 = vector.load %arg10[%c0_36, %c0_37] : memref<32x128xbf16, #tpu.memory_space<vmem>>, vector<32x128xbf16>
    %cst_38 = arith.constant dense<0.000000e+00> : vector<16x128xf32>
    %138 = tpu.matmul %136, %137, %cst_38 {dimension_numbers = #tpu.dot_dimension_numbers<[1], [0], [0], [1], [0, 0, 1, 1], [], []>} : vector<16x32xbf16>, vector<32x128xbf16>, vector<16x128xf32> -> vector<16x128xf32>
    %c0_39 = arith.constant 0 : index
    %c0_40 = arith.constant 0 : index
    %139 = vector.load %arg11[%c0_39, %c0_40] : memref<1x128xf32, #tpu.memory_space<vmem>>, vector<1x128xf32>
    %140 = vector.shape_cast %139 : vector<1x128xf32> to vector<128xf32>
    %141 = vector.shape_cast %140 : vector<128xf32> to vector<1x128xf32>
    %142 = vector.broadcast %141 : vector<1x128xf32> to vector<16x128xf32>
    %143 = arith.addf %138, %142 : vector<16x128xf32>
    %cst_41 = arith.constant 1.702000e+00 : f32
    %144 = vector.broadcast %cst_41 : f32 to vector<16x128xf32>
    %145 = arith.mulf %144, %143 : vector<16x128xf32>
    %146 = arith.negf %145 : vector<16x128xf32>
    %147 = math.exp %146 : vector<16x128xf32>
    %cst_42 = arith.constant 1.000000e+00 : f32
    %148 = vector.broadcast %cst_42 : f32 to vector<16x128xf32>
    %149 = arith.addf %148, %147 : vector<16x128xf32>
    %150 = arith.divf %148, %149 : vector<16x128xf32>
    %151 = arith.mulf %143, %150 : vector<16x128xf32>
    %152 = arith.truncf %151 : vector<16x128xf32> to vector<16x128xbf16>
    %c0_43 = arith.constant 0 : index
    %c0_44 = arith.constant 0 : index
    %153 = vector.load %arg12[%c0_43, %c0_44] : memref<128x32xbf16, #tpu.memory_space<vmem>>, vector<128x32xbf16>
    %cst_45 = arith.constant dense<0.000000e+00> : vector<16x32xf32>
    %154 = tpu.matmul %152, %153, %cst_45 {dimension_numbers = #tpu.dot_dimension_numbers<[1], [0], [0], [1], [0, 0, 1, 1], [], []>} : vector<16x128xbf16>, vector<128x32xbf16>, vector<16x32xf32> -> vector<16x32xf32>
    %c0_46 = arith.constant 0 : index
    %c0_47 = arith.constant 0 : index
    %155 = vector.load %arg13[%c0_46, %c0_47] : memref<1x32xf32, #tpu.memory_space<vmem>>, vector<1x32xf32>
    %156 = vector.shape_cast %155 : vector<1x32xf32> to vector<32xf32>
    %157 = vector.shape_cast %156 : vector<32xf32> to vector<1x32xf32>
    %158 = vector.broadcast %157 : vector<1x32xf32> to vector<16x32xf32>
    %159 = arith.addf %154, %158 : vector<16x32xf32>
    %160 = arith.addf %107, %159 : vector<16x32xf32>
    %161 = vector.shape_cast %160 : vector<16x32xf32> to vector<2x8x32xf32>
    %c0_48 = arith.constant 0 : index
    %c0_49 = arith.constant 0 : index
    %c0_50 = arith.constant 0 : index
    %162 = vector.load %arg14[%c0_48, %c0_49, %c0_50] : memref<2x8x32xf32, #tpu.memory_space<vmem>>, vector<2x8x32xf32>
    tpu.vector_store %arg14[%c0_48, %c0_49, %c0_50], %161 {strides = array<i32>} : memref<2x8x32xf32, #tpu.memory_space<vmem>>, vector<2x8x32xf32>,
    return
  }
}

</mosaic_0001>

<bundles_post_ra>
// kernel: tpu_custom_call.1
= control target key start
LH: loop header
LB: loop body
LE: loop exit
PB: predicated region body
PF: predicated region fallthrough
CT: control target
= control target key end

     0   :  { %vm51_vm0 = vcmask 261120   ;;  %s2262_s0 = inlined_call_operand.vmem [shape: f32[2,8,32], index: 0, kind: input, shape index: {}]   ;;  %s2263_s1 = inlined_call_operand.vmem [shape: f32[8,8], index: 1, kind: input, shape index: {}]   ;;  %s2264_s2 = inlined_call_operand.vmem [shape: f32[1,32], index: 2, kind: input, shape index: {}]   ;;  %s2265_s3 = inlined_call_operand.vmem [shape: f32[1,32], index: 3, kind: input, shape index: {}]   ;;  %s2266_s4 = inlined_call_operand.vmem [shape: bf16[32,96], index: 4, kind: input, shape index: {}]   ;;  %s2267_s5 = inlined_call_operand.vmem [shape: f32[1,96], index: 5, kind: input, shape index: {}]   ;;  %s2268_s6 = inlined_call_operand.vmem [shape: bf16[32,32], index: 6, kind: input, shape index: {}]   ;;  %s2269_s7 = inlined_call_operand.vmem [shape: f32[1,32], index: 7, kind: input, shape index: {}]   ;;  %s2270_s8 = inlined_call_operand.vmem [shape: f32[1,32], index: 8, kind: input, shape index: {}]   ;;  %s2271_s9 = inlined_call_operand.vmem [shape: f32[1,32], index: 9, kind: input, shape index: {}]   ;;  %s2272_s10 = inlined_call_operand.vmem [shape: bf16[32,128], index: 10, kind: input, shape index: {}]   ;;  %s2273_s11 = inlined_call_operand.vmem [shape: f32[1,128], index: 11, kind: input, shape index: {}]   ;;  %s2274_s12 = inlined_call_operand.vmem [shape: bf16[128,32], index: 12, kind: input, shape index: {}]   ;;  %s2275_s13 = inlined_call_operand.vmem [shape: f32[1,32], index: 13, kind: input, shape index: {}]   ;;  %s2276_s14 = inlined_call_operand.hbm [shape: f32[2,8,32], index: 14, kind: output, shape index: {}]  }
   0x1   :  { %v1927_v0 = vld [vmem:[%s2262_s0] sm:$0xff]  ;;  %v1932_v1 = vld [vmem:[%s2262_s0 + $0x8] sm:$0xff] }
   0x2   :  { %v52_v2 = vsel %vm51_vm0, %v1927_v0, 0.0  ;;  %v55_v3 = vsel %vm51_vm0, %v1932_v1, 0.0 }
   0x3   :  { %53 = vadd.xlane.f32.xlu0 %v52_v2 }
   0x7   :  { %56 = vadd.xlane.f32.xlu0 %v55_v3 }
   0x8   :  { %19 = vsyncpa [#allocation3], 0  ;;  %v1751_v14 = vld [vmem:[%s2266_s4] sm:$0xff]   ;;  %v1837_v15 = vmov 0.0   ;;  %v1752_v16 = vld [vmem:[%s2266_s4 + $0x8] sm:$0xff]   ;;  %vm1838_vm1 = vmmov 0  }
   0x9   :  { %1554 = vmatprep.subr.bf16.mxu0 %v1837_v15  ;;  %1574 = vmatprep.subr.bf16.mxu1 %v1837_v15  ;;  %v1461_v25 = vld [vmem:[%s2264_s2] ss:$0 sm:$0xff]  ;;  %s1839_s2 = smov 112   ;;  %s1841_s25 = smov 104   ;;  %vm227_vm2 = vcmask 64512   ;;  %vm718_vm3 = vcmask 1043456  }
   0xa   :  { %1555 = vmatpush3.bf16.msra.mxu0 %v1751_v14  ;;  %1558 = vmatprep.mubr.msk.bf16.mxu0 %vm1838_vm1, %v1837_v15  ;;  %v1462_v29 = vld [vmem:[%s2265_s3] ss:$0 sm:$0xff]  ;;  %s1840_s3 = smov 120   ;;  %s1844_s28 = smov 8   ;;  %vm1124_vm4 = vcmask 130048   ;;  %vm1127_vm5 = vcmask 195584  }
   0xb   :  { %1556 = vmatprep.subr.bf16.mxu0 %v1837_v15  ;;  %1576 = vmatprep.mubr.msk.bf16.mxu1 %vm1838_vm1, %v1837_v15  ;;  %v1463_v34 = vld [vmem:[%s2267_s5] ss:$0 sm:$0xff]  ;;  %s1842_s5 = smov 96   ;;  %s1845_s15 = smov 16  }
   0xc   :  { %s1846_s17 = smov 24  }
   0xe   :  { %1557 = vmatpush3.bf16.msra.mxu0 %v1752_v16 }
   0xf   :  { %1562 = vmatprep.subr.bf16.mxu0 %v1837_v15 }
  0x90   :  { %v54_v4 = vpop.xlane.xlu0 %53 }
  0x91   :  { %v59_v5 = vmul.f32 0.03125, %v54_v4 }
  0x93   :  { %v61_v6 = vsub.f32 %v1927_v0, %v59_v5 }
  0x94   :  { %v57_v7 = vpop.xlane.xlu0 %56 }
  0x95   :  { %v60_v8 = vmul.f32 0.03125, %v57_v7  ;;  %v63_v9 = vmul.f32 %v61_v6, %v61_v6 }
  0x97   :  { %v62_v10 = vsub.f32 %v1932_v1, %v60_v8  ;;  %v65_v11 = vsel %vm51_vm0, %v63_v9, 0.0 }
  0x98   :  { %66 = vadd.xlane.f32.xlu1 %v65_v11 }
  0x99   :  { %v64_v12 = vmul.f32 %v62_v10, %v62_v10 }
  0x9b   :  { %v68_v13 = vsel %vm51_vm0, %v64_v12, 0.0 }
  0x9c   :  { %69 = vadd.xlane.f32.xlu1 %v68_v13 }
 0x125   :  { %v67_v17 = vpop.xlane.xlu1 %66 }
 0x126   :  { %v71_v18 = vmul.f32 0.03125, %v67_v17 }
 0x128   :  { %v73_v19 = vadd.f32 1e-05, %v71_v18 }
 0x129   :  { %v70_v20 = vpop.xlane.xlu1 %69 }
 0x12a   :  { %1765 = vrsqrt.f32 %v73_v19  ;;  %v72_v21 = vmul.f32 0.03125, %v70_v20 }
 0x12c   :  { %v74_v22 = vadd.f32 1e-05, %v72_v21 }
 0x12e   :  { %1767 = vrsqrt.f32 %v74_v22 }
 0x134   :  { %v1766_v23 = vpop.eup %1765 }
 0x135   :  { %v77_v24 = vmul.f32 %v1766_v23, %v61_v6 }
 0x137   :  { %v86_v28 = vmul.f32 %v1461_v25, %v77_v24 }
 0x138   :  { %v1768_v26 = vpop.eup %1767 }
 0x139   :  { %v78_v27 = vmul.f32 %v1768_v26, %v62_v10  ;;  %v95_v31 = vadd.f32 %v1462_v29, %v86_v28 }
 0x13b   :  { %v87_v30 = vmul.f32 %v1461_v25, %v78_v27 }
 0x13d   :  { %v96_v32 = vadd.f32 %v1462_v29, %v87_v30 }
 0x13f   :  { %v97_v33 = vpack.c.bf16 %v96_v32, %v95_v31 }
 0x141   :  { %1559 = vmatmul.mubr.msk.bf16.vlgmr.msra.gmra.mrb[0].mxu0 %vm51_vm0, %v97_v33 }
 0x142   :  { %1564 = vmatprep.mubr.msk.bf16.mxu0 %vm1838_vm1, %v1837_v15 }
 0x214   :  { %v158_v35 = vpop.f32.mrb[0].mxu0 }
 0x215   :  { %v1560_v36 = vpop.f32.mrb[1].mxu0  ;;  %v159_v37 = vadd.f32 %v1463_v34, %v158_v35 }
 0x216   :  { %v161_v38 = vpop.f32.mrb[2].mxu0 }
 0x217   :  { %v162_v39 = vadd.f32 %v1463_v34, %v161_v38  ;;  %v1561_v40 = vpop.f32.mrb[3].mxu0  ;;  %v165_v42 = vmul.f32 0.35355338, %v159_v37  ;;  %v1974_v46 = vpack.c.bf16 %v159_v37, %v159_v37  ;;  %v223_v34 = vld [vmem:[%s2263_s1] sm:$0xff]  ;;  %s1843_s1 = smov 64  }
 0x219   :  { %v1711_v41 = vpack.i.bf16 %v162_v39, %v159_v37  ;;  %v166_v43 = vmul.f32 0.35355338, %v162_v39  ;;  %v1969_v45 = vpack.c.bf16 %v162_v39, %v162_v39  ;;  %v187_v2 = vpack.c.bf16 %v165_v42, %v165_v42 }
 0x21b   :  { %1712 = vrot.lane.b32.xlu1 %v1711_v41, %s1839_s2  ;;  %1707 = vrot.lane.b32.xlu0 %v1711_v41, %s1840_s3  ;;  %v1721_v44 = vpack.i.bf16 %v166_v43, %v165_v42  ;;  %v188_v5 = vpack.c.bf16 %v166_v43, %v166_v43 }
 0x21f   :  { %1717 = vrot.lane.b32.xlu1 %v1711_v41, %s1841_s25  ;;  %275 = vrot.lane.b32.xlu0 %v1969_v45, %s1842_s5 }
 0x223   :  { %225 = vrot.lane.b32.xlu1 %v1974_v46, %s1842_s5 }
 0x28d   :  { %v1713_v47 = vpop.permute.xlu1 %1712  ;;  %v1708_v48 = vpop.permute.xlu0 %1707 }
 0x28e   :  { %v1710_v49 = vunpack.i.h.bf16 %v1708_v48  ;;  %v1709_v50 = vunpack.i.l.bf16 %v1708_v48  ;;  %v1714_v51 = vunpack.i.l.bf16 %v1713_v47  ;;  %v1715_v55 = vunpack.i.h.bf16 %v1713_v47 }
 0x290   :  { %v1978_v52 = vpack.c.bf16 %v1710_v49, %v1710_v49  ;;  %v1980_v53 = vpack.c.bf16 %v1709_v50, %v1709_v50  ;;  %v1986_v56 = vpack.c.bf16 %v1714_v51, %v1714_v51  ;;  %v1991_v59 = vpack.c.bf16 %v1715_v55, %v1715_v55 }
 0x291   :  { %v1718_v54 = vpop.permute.xlu1 %1717  ;;  %v276_v62 = vpop.permute.xlu0 %275 }
 0x292   :  { %324 = vrot.lane.b32.xlu1 %v1980_v53, %s1842_s5  ;;  %373 = vrot.lane.b32.xlu0 %v1978_v52, %s1842_s5  ;;  %v1720_v60 = vunpack.i.h.bf16 %v1718_v54  ;;  %v1719_v61 = vunpack.i.l.bf16 %v1718_v54  ;;  %v281_v4 = vsel %vm227_vm2, %v276_v62, 0 }
 0x294   :  { %v1997_v63 = vpack.c.bf16 %v1720_v60, %v1720_v60  ;;  %v1999_v3 = vpack.c.bf16 %v1719_v61, %v1719_v61 }
 0x295   :  { %v226_v57 = vpop.permute.xlu1 %225 }
 0x296   :  { %v232_v58 = vsel %vm227_vm2, %v226_v57, 0  ;;  %422 = vrot.lane.b32.xlu0 %v1986_v56, %s1842_s5  ;;  %1722 = vrot.lane.b32.xlu1 %v1721_v44, %s1840_s3 }
 0x297   :  { %1563 = vmatpush3.bf16.xpose.msra.mxu0 %v232_v58 }
 0x298   :  { %1568 = vmatprep.subr.bf16.mxu0 %v1837_v15 }
 0x29a   :  { %1727 = vrot.lane.b32.xlu0 %v1721_v44, %s1839_s2  ;;  %471 = vrot.lane.b32.xlu1 %v1991_v59, %s1842_s5 }
 0x29e   :  { %1565 = vmatmul.mubr.msk.bf16.vlgmr.msra.gmra.mrb[4].mxu0 %vm227_vm2, %v187_v2  ;;  %569 = vrot.lane.b32.xlu0 %v1997_v63, %s1842_s5 }
 0x29f   :  { %520 = vrot.lane.b32.xlu1 %v1999_v3, %s1842_s5  ;;  %1569 = vmatpush3.bf16.xpose.msra.mxu0 %v281_v4 }
 0x2a0   :  { %1570 = vmatprep.mubr.msk.bf16.mxu0 %vm1838_vm1, %v1837_v15  ;;  %1580 = vmatprep.subr.bf16.mxu0 %v1837_v15 }
 0x2a3   :  { %1732 = vrot.lane.b32.xlu1 %v1721_v44, %s1841_s25 }
 0x2a6   :  { %1571 = vmatmul.mubr.msk.bf16.vlgmr.msra.gmra.mrb[8].mxu0 %vm227_vm2, %v188_v5 }
 0x2a7   :  { %1582 = vmatprep.mubr.msk.bf16.mxu0 %vm1838_vm1, %v1837_v15 }
 0x304   :  { %v325_v6 = vpop.permute.xlu1 %324  ;;  %v374_v7 = vpop.permute.xlu0 %373 }
 0x305   :  { %v379_v8 = vsel %vm227_vm2, %v374_v7, 0  ;;  %v330_v9 = vsel %vm227_vm2, %v325_v6, 0 }
 0x306   :  { %1575 = vmatpush3.bf16.xpose.msra.mxu1 %v330_v9  ;;  %1581 = vmatpush3.bf16.xpose.msra.mxu0 %v379_v8 }
 0x307   :  { %1586 = vmatprep.subr.bf16.mxu1 %v1837_v15  ;;  %1592 = vmatprep.subr.bf16.mxu0 %v1837_v15 }
 0x308   :  { %v423_v10 = vpop.permute.xlu0 %422  ;;  %v1723_v11 = vpop.permute.xlu1 %1722 }
 0x309   :  { %v1725_v12 = vunpack.i.h.bf16 %v1723_v11  ;;  %v1724_v13 = vunpack.i.l.bf16 %v1723_v11  ;;  %v428_v19 = vsel %vm227_vm2, %v423_v10, 0 }
 0x30b   :  { %v190_v14 = vpack.c.bf16 %v1725_v12, %v1725_v12  ;;  %v189_v16 = vpack.c.bf16 %v1724_v13, %v1724_v13 }
 0x30c   :  { %v1728_v17 = vpop.permute.xlu0 %1727  ;;  %v472_v18 = vpop.permute.xlu1 %471 }
 0x30d   :  { %v477_v20 = vsel %vm227_vm2, %v472_v18, 0  ;;  %1577 = vmatmul.mubr.msk.bf16.vlgmr.msra.gmra.mrb[0].mxu1 %vm227_vm2, %v189_v16  ;;  %1583 = vmatmul.mubr.msk.bf16.vlgmr.msra.gmra.mrb[12].mxu0 %vm227_vm2, %v190_v14  ;;  %v1730_v21 = vunpack.i.h.bf16 %v1728_v17  ;;  %v1729_v22 = vunpack.i.l.bf16 %v1728_v17 }
 0x30e   :  { %1587 = vmatpush3.bf16.xpose.msra.mxu1 %v428_v19  ;;  %1593 = vmatpush3.bf16.xpose.msra.mxu0 %v477_v20 }
 0x30f   :  { %1588 = vmatprep.mubr.msk.bf16.mxu1 %vm1838_vm1, %v1837_v15  ;;  %1594 = vmatprep.mubr.msk.bf16.mxu0 %vm1838_vm1, %v1837_v15  ;;  %v192_v25 = vpack.c.bf16 %v1730_v21, %v1730_v21  ;;  %v191_v26 = vpack.c.bf16 %v1729_v22, %v1729_v22 }
 0x310   :  { %1598 = vmatprep.subr.bf16.mxu1 %v1837_v15  ;;  %1604 = vmatprep.subr.bf16.mxu0 %v1837_v15  ;;  %v570_v24 = vpop.permute.xlu0 %569 }
 0x311   :  { %v521_v23 = vpop.permute.xlu1 %520  ;;  %v575_v27 = vsel %vm227_vm2, %v570_v24, 0 }
 0x312   :  { %v526_v28 = vsel %vm227_vm2, %v521_v23, 0 }
 0x315   :  { %v1733_v29 = vpop.permute.xlu1 %1732  ;;  %1589 = vmatmul.mubr.msk.bf16.vlgmr.msra.gmra.mrb[4].mxu1 %vm227_vm2, %v191_v26  ;;  %1595 = vmatmul.mubr.msk.bf16.vlgmr.msra.gmra.mrb[16].mxu0 %vm227_vm2, %v192_v25 }
 0x316   :  { %1599 = vmatpush3.bf16.xpose.msra.mxu1 %v526_v28  ;;  %1605 = vmatpush3.bf16.xpose.msra.mxu0 %v575_v27  ;;  %v1735_v30 = vunpack.i.h.bf16 %v1733_v29  ;;  %v1734_v31 = vunpack.i.l.bf16 %v1733_v29 }
 0x317   :  { %1600 = vmatprep.mubr.msk.bf16.mxu1 %vm1838_vm1, %v1837_v15  ;;  %1606 = vmatprep.mubr.msk.bf16.mxu0 %vm1838_vm1, %v1837_v15 }
 0x318   :  { %1616 = vmatprep.subr.bf16.mxu0 %v1837_v15  ;;  %1610 = vmatprep.subr.bf16.mxu1 %v1837_v15  ;;  %v194_v32 = vpack.c.bf16 %v1735_v30, %v1735_v30  ;;  %v193_v33 = vpack.c.bf16 %v1734_v31, %v1734_v31 }
 0x31d   :  { %1601 = vmatmul.mubr.msk.bf16.vlgmr.msra.gmra.mrb[8].mxu1 %vm227_vm2, %v193_v33  ;;  %1607 = vmatmul.mubr.msk.bf16.vlgmr.msra.gmra.mrb[20].mxu0 %vm227_vm2, %v194_v32 }
 0x31e   :  { %1612 = vmatprep.mubr.msk.bf16.mxu1 %vm1838_vm1, %v1837_v15  ;;  %1618 = vmatprep.mubr.msk.bf16.mxu0 %vm1838_vm1, %v1837_v15 }
 0x371   :  { %v268_v35 = vpop.f32.mrb[4].mxu0 }
 0x372   :  { %v269_v36 = vadd.f32 %v268_v35, %v223_v34  ;;  %v1566_v37 = vpop.f32.mrb[5].mxu0 }
 0x373   :  { %v271_v38 = vpop.f32.mrb[6].mxu0 }
 0x374   :  { %v1567_v39 = vpop.f32.mrb[7].mxu0  ;;  %v617_v40 = vsel %vm227_vm2, %v269_v36, -inf }
 0x375   :  { %618 = vmax.xlane.f32.xlu0 %v617_v40 }
 0x379   :  { %v317_v41 = vpop.f32.mrb[8].mxu0 }
 0x37a   :  { %v318_v42 = vadd.f32 %v317_v41, %v223_v34  ;;  %v1572_v43 = vpop.f32.mrb[9].mxu0 }
 0x37b   :  { %v320_v44 = vpop.f32.mrb[10].mxu0 }
 0x37c   :  { %v1573_v47 = vpop.f32.mrb[11].mxu0  ;;  %v620_v48 = vsel %vm227_vm2, %v318_v42, -inf }
 0x37d   :  { %621 = vmax.xlane.f32.xlu1 %v620_v48 }
 0x3e0   :  { %v366_v49 = vpop.f32.mrb[0].mxu1  ;;  %v415_v50 = vpop.f32.mrb[12].mxu0 }
 0x3e1   :  { %v367_v51 = vadd.f32 %v366_v49, %v223_v34  ;;  %v1578_v54 = vpop.f32.mrb[1].mxu1  ;;  %v1584_v55 = vpop.f32.mrb[13].mxu0  ;;  %v2049_v60 = vadd.f32 %v415_v50, %v223_v34 }
 0x3e2   :  { %v369_v57 = vpop.f32.mrb[2].mxu1  ;;  %v418_v58 = vpop.f32.mrb[14].mxu0 }
 0x3e3   :  { %v1579_v61 = vpop.f32.mrb[3].mxu1  ;;  %v1585_v62 = vpop.f32.mrb[15].mxu0  ;;  %v623_v2 = vsel %vm227_vm2, %v367_v51, -inf  ;;  %v626_v4 = vsel %vm227_vm2, %v2049_v60, -inf }
 0x3e4   :  { %624 = vmax.xlane.f32.xlu0 %v623_v2 }
 0x3e8   :  { %v464_v5 = vpop.f32.mrb[4].mxu1  ;;  %627 = vmax.xlane.f32.xlu0 %v626_v4  ;;  %v513_v6 = vpop.f32.mrb[16].mxu0 }
 0x3e9   :  { %v2054_v7 = vadd.f32 %v464_v5, %v223_v34  ;;  %v514_v8 = vadd.f32 %v513_v6, %v223_v34  ;;  %v1590_v9 = vpop.f32.mrb[5].mxu1  ;;  %v1596_v10 = vpop.f32.mrb[17].mxu0 }
 0x3ea   :  { %v467_v11 = vpop.f32.mrb[6].mxu1  ;;  %v516_v12 = vpop.f32.mrb[18].mxu0 }
 0x3eb   :  { %v1591_v13 = vpop.f32.mrb[7].mxu1  ;;  %v1597_v14 = vpop.f32.mrb[19].mxu0  ;;  %v629_v16 = vsel %vm227_vm2, %v2054_v7, -inf  ;;  %v632_v17 = vsel %vm227_vm2, %v514_v8, -inf }
 0x3ec   :  { %630 = vmax.xlane.f32.xlu0 %v629_v16  ;;  %633 = vmax.xlane.f32.xlu1 %v632_v17 }
 0x3f0   :  { %v562_v18 = vpop.f32.mrb[8].mxu1  ;;  %v611_v19 = vpop.f32.mrb[20].mxu0 }
 0x3f1   :  { %v2059_v20 = vadd.f32 %v562_v18, %v223_v34  ;;  %v1602_v21 = vpop.f32.mrb[9].mxu1  ;;  %v1608_v22 = vpop.f32.mrb[21].mxu0  ;;  %v612_v31 = vadd.f32 %v611_v19, %v223_v34 }
 0x3f2   :  { %v565_v23 = vpop.f32.mrb[10].mxu1  ;;  %v614_v24 = vpop.f32.mrb[22].mxu0 }
 0x3f3   :  { %v1603_v25 = vpop.f32.mrb[11].mxu1  ;;  %v1609_v26 = vpop.f32.mrb[23].mxu0  ;;  %v635_v27 = vsel %vm227_vm2, %v2059_v20, -inf  ;;  %v638_v32 = vsel %vm227_vm2, %v612_v31, -inf }
 0x3f4   :  { %636 = vmax.xlane.f32.xlu0 %v635_v27 }
 0x3fd   :  { %762 = vrot.lane.b32.xlu1 %v1969_v45, %s1843_s1 }
 0x401   :  { %810 = vrot.lane.b32.xlu1 %v1980_v53, %s1843_s1 }
 0x402   :  { %v619_v28 = vpop.xlane.xlu0 %618 }
 0x403   :  { %v641_v29 = vsub.f32 %v269_v36, %v619_v28 }
 0x405   :  { %v649_v30 = vmul.f32 1.442695, %v641_v29 }
 0x407   :  { %1769 = vpow2.f32 %v649_v30 }
 0x40a   :  { %713 = vrot.lane.b32.xlu0 %v1974_v46, %s1843_s1  ;;  %v622_v45 = vpop.xlane.xlu1 %621 }
 0x40b   :  { %v642_v53 = vsub.f32 %v318_v42, %v622_v45 }
 0x40d   :  { %v651_v46 = vmul.f32 1.442695, %v642_v53 }
 0x40f   :  { %1771 = vpow2.f32 %v651_v46 }
 0x411   :  { %v2070_v33 = vpop.eup %1769 }
 0x412   :  { %v665_v35 = vsel %vm227_vm2, %v2070_v33, 0.0 }
 0x419   :  { %v2076_v36 = vpop.eup %1771 }
 0x41a   :  { %v668_v34 = vsel %vm227_vm2, %v2076_v36, 0.0 }
 0x425   :  { %639 = vmax.xlane.f32.xlu1 %v638_v32 }
 0x429   :  { %666 = vadd.xlane.f32.xlu0 %v665_v35 }
 0x436   :  { %858 = vrot.lane.b32.xlu1 %v1978_v52, %s1843_s1 }
 0x45a   :  { %669 = vadd.xlane.f32.xlu1 %v668_v34 }
 0x46b   :  { %954 = vrot.lane.b32.xlu1 %v1991_v59, %s1843_s1 }
 0x471   :  { %v625_v37 = vpop.xlane.xlu0 %624 }
 0x472   :  { %v643_v38 = vsub.f32 %v367_v51, %v625_v37 }
 0x474   :  { %v653_v39 = vmul.f32 1.442695, %v643_v38 }
 0x475   :  { %v628_v40 = vpop.xlane.xlu0 %627 }
 0x476   :  { %1773 = vpow2.f32 %v653_v39  ;;  %v644_v52 = vsub.f32 %v2049_v60, %v628_v40 }
 0x478   :  { %v655_v42 = vmul.f32 1.442695, %v644_v52 }
 0x479   :  { %v634_v41 = vpop.xlane.xlu1 %633  ;;  %v631_v43 = vpop.xlane.xlu0 %630 }
 0x47a   :  { %v646_v44 = vsub.f32 %v514_v8, %v634_v41  ;;  %1775 = vpow2.f32 %v655_v42  ;;  %v645_v62 = vsub.f32 %v2054_v7, %v631_v43 }
 0x47c   :  { %v659_v59 = vmul.f32 1.442695, %v646_v44  ;;  %v657_v2 = vmul.f32 1.442695, %v645_v62 }
 0x47d   :  { %v763_v47 = vpop.permute.xlu1 %762 }
 0x47e   :  { %v768_v48 = vsel %vm718_vm3, %v763_v47, 0  ;;  %1777 = vpow2.f32 %v659_v59 }
 0x47f   :  { %1617 = vmatpush3.bf16.msra.mxu0 %v768_v48  ;;  %1779 = vpow2.f32 %v657_v2 }
 0x480   :  { %v2084_v49 = vpop.eup %1773  ;;  %1628 = vmatprep.subr.bf16.mxu0 %v1837_v15 }
 0x481   :  { %v637_v50 = vpop.xlane.xlu0 %636  ;;  %v671_v51 = vsel %vm227_vm2, %v2084_v49, 0.0  ;;  %v811_v6 = vpop.permute.xlu1 %810 }
 0x482   :  { %672 = vadd.xlane.f32.xlu0 %v671_v51  ;;  %v647_v4 = vsub.f32 %v2059_v20, %v637_v50  ;;  %v816_v20 = vsel %vm718_vm3, %v811_v6, 0 }
 0x484   :  { %v2091_v57 = vpop.eup %1775  ;;  %v661_v5 = vmul.f32 1.442695, %v647_v4 }
 0x485   :  { %v714_v54 = vpop.permute.xlu0 %713  ;;  %v674_v58 = vsel %vm227_vm2, %v2091_v57, 0.0 }
 0x486   :  { %v720_v55 = vsel %vm718_vm3, %v714_v54, 0  ;;  %1781 = vpow2.f32 %v661_v5 }
 0x487   :  { %1611 = vmatpush3.bf16.msra.mxu1 %v720_v55 }
 0x488   :  { %1622 = vmatprep.subr.bf16.mxu1 %v1837_v15  ;;  %v2095_v60 = vpop.eup %1777 }
 0x489   :  { %v680_v61 = vsel %vm227_vm2, %v2095_v60, 0.0  ;;  %v2103_v9 = vpop.eup %1779 }
 0x48a   :  { %v677_v13 = vsel %vm227_vm2, %v2103_v9, 0.0 }
 0x48f   :  { %675 = vadd.xlane.f32.xlu1 %v674_v58 }
 0x490   :  { %v2107_v14 = vpop.eup %1781 }
 0x493   :  { %681 = vadd.xlane.f32.xlu1 %v680_v61 }
 0x498   :  { %906 = vrot.lane.b32.xlu0 %v1986_v56, %s1843_s1  ;;  %v683_v56 = vsel %vm227_vm2, %v2107_v14, 0.0 }
 0x4b2   :  { %v640_v8 = vpop.xlane.xlu1 %639 }
 0x4b3   :  { %v648_v10 = vsub.f32 %v612_v31, %v640_v8 }
 0x4b5   :  { %v663_v11 = vmul.f32 1.442695, %v648_v10 }
 0x4b6   :  { %v667_v12 = vpop.xlane.xlu0 %666  ;;  %v859_v21 = vpop.permute.xlu1 %858 }
 0x4b7   :  { %1783 = vpow2.f32 %v663_v11  ;;  %678 = vadd.xlane.f32.xlu0 %v677_v13  ;;  %v864_v26 = vsel %vm718_vm3, %v859_v21, 0 }
 0x4b8   :  { %1785 = vrcp.f32 %v667_v12 }
 0x4bb   :  { %684 = vadd.xlane.f32.xlu0 %v683_v56 }
 0x4c1   :  { %v2111_v7 = vpop.eup %1783 }
 0x4c2   :  { %v1786_v16 = vpop.eup %1785  ;;  %v686_v17 = vsel %vm227_vm2, %v2111_v7, 0.0 }
 0x4c3   :  { %v697_v18 = vmul.f32 %v1786_v16, %v2070_v33  ;;  %687 = vadd.xlane.f32.xlu1 %v686_v17 }
 0x4c5   :  { %v705_v19 = vpack.c.bf16 %v697_v18, %v697_v18 }
 0x4c7   :  { %1613 = vmatmul.mubr.msk.bf16.vlgmr.msra.gmra.mrb[12].mxu1 %vm227_vm2, %v705_v19  ;;  %v1753_v19 = vld [vmem:[%s2268_s6] sm:$0xff]  }
 0x4c8   :  { %1623 = vmatpush3.bf16.msra.mxu1 %v816_v20  ;;  %1624 = vmatprep.mubr.msk.bf16.mxu1 %vm1838_vm1, %v1837_v15 }
 0x4c9   :  { %1634 = vmatprep.subr.bf16.mxu1 %v1837_v15 }
 0x4d1   :  { %1002 = vrot.lane.b32.xlu0 %v1999_v3, %s1843_s1 }
 0x4d4   :  { %1050 = vrot.lane.b32.xlu1 %v1997_v63, %s1843_s1 }
 0x4e7   :  { %v670_v22 = vpop.xlane.xlu1 %669 }
 0x4e8   :  { %1787 = vrcp.f32 %v670_v22 }
 0x4eb   :  { %v955_v63 = vpop.permute.xlu1 %954 }
 0x4f2   :  { %v1788_v23 = vpop.eup %1787 }
 0x4f3   :  { %v698_v24 = vmul.f32 %v1788_v23, %v2076_v36  ;;  %v960_v36 = vsel %vm718_vm3, %v955_v63, 0 }
 0x4f5   :  { %v706_v25 = vpack.c.bf16 %v698_v24, %v698_v24 }
 0x4f7   :  { %1619 = vmatmul.mubr.msk.bf16.vlgmr.msra.gmra.mrb[24].mxu0 %vm227_vm2, %v706_v25  ;;  %v1754_v25 = vld [vmem:[%s2268_s6 + $0x8] sm:$0xff]  }
 0x4f8   :  { %1629 = vmatpush3.bf16.msra.mxu0 %v864_v26  ;;  %1630 = vmatprep.mubr.msk.bf16.mxu0 %vm1838_vm1, %v1837_v15 }
 0x4f9   :  { %1640 = vmatprep.subr.bf16.mxu0 %v1837_v15 }
 0x50f   :  { %v673_v3 = vpop.xlane.xlu0 %672 }
 0x510   :  { %1789 = vrcp.f32 %v673_v3 }
 0x513   :  { %v907_v29 = vpop.permute.xlu0 %906 }
 0x514   :  { %v912_v32 = vsel %vm718_vm3, %v907_v29, 0 }
 0x51a   :  { %v1790_v27 = vpop.eup %1789 }
 0x51b   :  { %v699_v28 = vmul.f32 %v1790_v27, %v2084_v49 }
 0x51c   :  { %v676_v30 = vpop.xlane.xlu1 %675 }
 0x51d   :  { %1791 = vrcp.f32 %v676_v30  ;;  %v707_v31 = vpack.c.bf16 %v699_v28, %v699_v28 }
 0x51f   :  { %1625 = vmatmul.mubr.msk.bf16.vlgmr.msra.gmra.mrb[16].mxu1 %vm227_vm2, %v707_v31 }
 0x520   :  { %1635 = vmatpush3.bf16.msra.mxu1 %v912_v32  ;;  %v682_v33 = vpop.xlane.xlu1 %681  ;;  %1636 = vmatprep.mubr.msk.bf16.mxu1 %vm1838_vm1, %v1837_v15 }
 0x521   :  { %1793 = vrcp.f32 %v682_v33  ;;  %1646 = vmatprep.subr.bf16.mxu1 %v1837_v15 }
 0x527   :  { %v1792_v35 = vpop.eup %1791 }
 0x528   :  { %v700_v45 = vmul.f32 %v1792_v35, %v2091_v57 }
 0x52a   :  { %v708_v53 = vpack.c.bf16 %v700_v45, %v700_v45 }
 0x52b   :  { %v1794_v46 = vpop.eup %1793 }
 0x52c   :  { %1631 = vmatmul.mubr.msk.bf16.vlgmr.msra.gmra.mrb[28].mxu0 %vm227_vm2, %v708_v53  ;;  %v702_v34 = vmul.f32 %v1794_v46, %v2095_v60 }
 0x52d   :  { %1641 = vmatpush3.bf16.msra.mxu0 %v960_v36  ;;  %1642 = vmatprep.mubr.msk.bf16.mxu0 %vm1838_vm1, %v1837_v15 }
 0x52e   :  { %1652 = vmatprep.subr.bf16.mxu0 %v1837_v15  ;;  %v710_v37 = vpack.c.bf16 %v702_v34, %v702_v34 }
 0x534   :  { %1643 = vmatmul.mubr.msk.bf16.vlgmr.msra.gmra.mrb[32].mxu0 %vm227_vm2, %v710_v37 }
 0x535   :  { %1654 = vmatprep.mubr.msk.bf16.mxu0 %vm1838_vm1, %v1837_v15 }
 0x544   :  { %v679_v38 = vpop.xlane.xlu0 %678 }
 0x545   :  { %1795 = vrcp.f32 %v679_v38 }
 0x548   :  { %v685_v39 = vpop.xlane.xlu0 %684 }
 0x549   :  { %1797 = vrcp.f32 %v685_v39 }
 0x54c   :  { %v1003_v42 = vpop.permute.xlu0 %1002 }
 0x54d   :  { %v1008_v47 = vsel %vm718_vm3, %v1003_v42, 0 }
 0x54f   :  { %v1796_v40 = vpop.eup %1795 }
 0x550   :  { %v701_v52 = vmul.f32 %v1796_v40, %v2103_v9  ;;  %v688_v41 = vpop.xlane.xlu1 %687 }
 0x551   :  { %1799 = vrcp.f32 %v688_v41 }
 0x552   :  { %v709_v43 = vpack.c.bf16 %v701_v52, %v701_v52 }
 0x553   :  { %v1798_v44 = vpop.eup %1797 }
 0x554   :  { %1637 = vmatmul.mubr.msk.bf16.vlgmr.msra.gmra.mrb[20].mxu1 %vm227_vm2, %v709_v43  ;;  %v1051_v48 = vpop.permute.xlu1 %1050  ;;  %v703_v59 = vmul.f32 %v1798_v44, %v2107_v14 }
 0x555   :  { %1647 = vmatpush3.bf16.msra.mxu1 %v1008_v47  ;;  %v1056_v49 = vsel %vm718_vm3, %v1051_v48, 0  ;;  %1648 = vmatprep.mubr.msk.bf16.mxu1 %vm1838_vm1, %v1837_v15  ;;  %v1483_v47 = vld [vmem:[%s2269_s7] ss:$0 sm:$0xff]  ;;  %s1847_s7 = smov [#allocation2]  }
 0x556   :  { %1653 = vmatpush3.bf16.msra.mxu0 %v1056_v49  ;;  %1658 = vmatprep.subr.bf16.mxu1 %v1837_v15  ;;  %v711_v50 = vpack.c.bf16 %v703_v59, %v703_v59  ;;  %s1450_s19 = sshll.u32 %s1847_s7, 4  ;;  %s1451_s19 = int_to_ptr.vmem [resolvable:$true] %s1450_s19 }
 0x557   :  { %1666 = vmatprep.subr.bf16.mxu0 %v1837_v15  ;;  %s1813_s4 = scalar_lea.vmem %s1451_s19, 256  ;;  %p1818_p1 = scmp.lt.s32.totalorder %s1451_s19, %s1451_s19 }
 0x558   :  { %p1814_p0 = scmp.ne.s32.totalorder %s1451_s19, %s1813_s4  ;;  %p1819_p2 = scmp.lt.s32.totalorder %s1813_s4, %s1813_s4 }
 0x55a   :  { %p1820_p3 = por %p1819_p2, %p1818_p1 }
 0x55b   :  { %v1800_v51 = vpop.eup %1799 }
 0x55c   :  { %v704_v54 = vmul.f32 %v1800_v51, %v2111_v7  ;;  %1649 = vmatmul.mubr.msk.bf16.vlgmr.msra.gmra.mrb[24].mxu1 %vm227_vm2, %v711_v50  ;;  %p1821_p4 = pnand %p1820_p3, %p1814_p0 }
 0x55d   :  { %1662 = vmatprep.mubr.msk.bf16.mxu1 %vm1838_vm1, %v1837_v15  ;;  %1659 = vmatpush3.bf16.msra.mxu1 %v1753_v19  ;;  %v1487_v19 = vld [vmem:[%s2270_s8] ss:$0 sm:$0xff] }
 0x55e   :  { %v712_v55 = vpack.c.bf16 %v704_v54, %v704_v54  ;;  %1660 = vmatprep.subr.bf16.mxu1 %v1837_v15 }
 0x560   :  { %1655 = vmatmul.mubr.msk.bf16.vlgmr.msra.gmra.mrb[36].mxu0 %vm227_vm2, %v712_v55 }
 0x561   :  { %1670 = vmatprep.mubr.msk.bf16.mxu0 %vm1838_vm1, %v1837_v15  ;;  %1661 = vmatpush3.bf16.msra.mxu1 %v1754_v25 }
 0x562   :  { %1674 = vmatprep.subr.bf16.mxu1 %v1837_v15 }
 0x59a   :  { %v756_v57 = vpop.f32.mrb[12].mxu1 }
 0x59b   :  { %v1614_v58 = vpop.f32.mrb[13].mxu1 }
 0x59c   :  { %v759_v60 = vpop.f32.mrb[14].mxu1 }
 0x59d   :  { %v1615_v61 = vpop.f32.mrb[15].mxu1 }
 0x5ca   :  { %v804_v62 = vpop.f32.mrb[24].mxu0 }
 0x5cb   :  { %v1620_v2 = vpop.f32.mrb[25].mxu0 }
 0x5cc   :  { %v807_v4 = vpop.f32.mrb[26].mxu0 }
 0x5cd   :  { %v1621_v5 = vpop.f32.mrb[27].mxu0 }
 0x5f2   :  { %v852_v6 = vpop.f32.mrb[16].mxu1 }
 0x5f3   :  { %v1626_v8 = vpop.f32.mrb[17].mxu1 }
 0x5f4   :  { %v855_v9 = vpop.f32.mrb[18].mxu1 }
 0x5f5   :  { %v1627_v10 = vpop.f32.mrb[19].mxu1 }
 0x5f6   :  { %v1755_v10 = vld [vmem:[%s2272_s10] sm:$0xff]  }
 0x5f7   :  { %1667 = vmatpush3.bf16.msra.mxu0 %v1755_v10 }
 0x5f8   :  { %1668 = vmatprep.subr.bf16.mxu0 %v1837_v15 }
 0x5ff   :  { %v900_v11 = vpop.f32.mrb[28].mxu0 }
 0x600   :  { %v1736_v12 = vpack.i.bf16 %v900_v11, %v852_v6  ;;  %v1632_v13 = vpop.f32.mrb[29].mxu0  ;;  %v1756_v11 = vld [vmem:[%s2272_s10 + $0x8] sm:$0xff]  }
 0x601   :  { %v903_v14 = vpop.f32.mrb[30].mxu0  ;;  %1669 = vmatpush3.bf16.msra.mxu0 %v1756_v11 }
 0x602   :  { %1737 = vrot.lane.b32.xlu0 %v1736_v12, %s1844_s28  ;;  %v1633_v56 = vpop.f32.mrb[31].mxu0 }
 0x607   :  { %v996_v7 = vpop.f32.mrb[32].mxu0 }
 0x608   :  { %v1644_v16 = vpop.f32.mrb[33].mxu0 }
 0x609   :  { %v999_v17 = vpop.f32.mrb[34].mxu0 }
 0x60a   :  { %v1645_v18 = vpop.f32.mrb[35].mxu0 }
 0x627   :  { %v948_v20 = vpop.f32.mrb[20].mxu1 }
 0x628   :  { %v1741_v21 = vpack.i.bf16 %v996_v7, %v948_v20  ;;  %v1638_v22 = vpop.f32.mrb[21].mxu1 }
 0x629   :  { %v951_v23 = vpop.f32.mrb[22].mxu1 }
 0x62a   :  { %v1639_v24 = vpop.f32.mrb[23].mxu1  ;;  %1742 = vrot.lane.b32.xlu1 %v1741_v21, %s1845_s15  ;;  %v1488_v23 = vld [vmem:[%s2271_s9] ss:$0 sm:$0xff] }
 0x62f   :  { %v1044_v26 = vpop.f32.mrb[24].mxu1 }
 0x630   :  { %v1650_v3 = vpop.f32.mrb[25].mxu1 }
 0x631   :  { %v1047_v63 = vpop.f32.mrb[26].mxu1 }
 0x632   :  { %v1651_v27 = vpop.f32.mrb[27].mxu1  ;;  %v1757_v63 = vld [vmem:[%s2274_s12] sm:$0xff]  }
 0x633   :  { %v1092_v28 = vpop.f32.mrb[36].mxu0  ;;  %v1758_v27 = vld [vmem:[%s2274_s12 + $0x8] sm:$0xff]  }
 0x634   :  { %v1746_v29 = vpack.i.bf16 %v1092_v28, %v1044_v26  ;;  %v1656_v30 = vpop.f32.mrb[37].mxu0  ;;  %v1759_v28 = vld [vmem:[%s2274_s12 + $0x10] sm:$0xff]  }
 0x635   :  { %v1095_v31 = vpop.f32.mrb[38].mxu0  ;;  %v1761_v30 = vld [vmem:[%s2274_s12 + $0x20] sm:$0xff]  }
 0x636   :  { %1747 = vrot.lane.b32.xlu0 %v1746_v29, %s1846_s17  ;;  %v1657_v32 = vpop.f32.mrb[39].mxu0  ;;  %v1760_v29 = vld [vmem:[%s2274_s12 + $0x18] sm:$0xff]   ;;  %v1762_v31 = vld [vmem:[%s2274_s12 + $0x28] sm:$0xff]  }
 0x637   :  { %v1763_v32 = vld [vmem:[%s2274_s12 + $0x30] sm:$0xff]  }
 0x674   :  { %v1738_v33 = vpop.permute.xlu0 %1737 }
 0x675   :  { %v1740_v45 = vunpack.i.h.bf16 %v1738_v33  ;;  %v1739_v53 = vunpack.i.l.bf16 %v1738_v33  ;;  %v1764_v33 = vld [vmem:[%s2274_s12 + $0x38] sm:$0xff]  }
 0x677   :  { %v1123_v37 = vsel %vm227_vm2, %v804_v62, %v1740_v45  ;;  %v1122_v38 = vsel %vm227_vm2, %v756_v57, %v1739_v53 }
 0x69c   :  { %v1743_v35 = vpop.permute.xlu1 %1742 }
 0x69d   :  { %v1745_v46 = vunpack.i.h.bf16 %v1743_v35  ;;  %v1744_v36 = vunpack.i.l.bf16 %v1743_v35  ;;  %v1489_v35 = vld [vmem:[%s2273_s11] ss:$0 sm:$0xff] }
 0x69f   :  { %v1126_v52 = vsel %vm1124_vm4, %v1123_v37, %v1745_v46  ;;  %v1125_v41 = vsel %vm1124_vm4, %v1122_v38, %v1744_v36 }
 0x6a8   :  { %v1748_v34 = vpop.permute.xlu0 %1747 }
 0x6a9   :  { %v1750_v39 = vunpack.i.h.bf16 %v1748_v34  ;;  %v1749_v40 = vunpack.i.l.bf16 %v1748_v34 }
 0x6ab   :  { %v1129_v42 = vsel %vm1127_vm5, %v1126_v52, %v1750_v39  ;;  %v1128_v43 = vsel %vm1127_vm5, %v1125_v41, %v1749_v40 }
 0x6ac   :  { %v1130_v44 = vpack.c.bf16 %v1129_v42, %v1128_v43 }
 0x6ae   :  { %1663 = vmatmul.mubr.msk.bf16.vlgmr.msra.gmra.mrb[28].mxu1 %vm51_vm0, %v1130_v44 }
 0x6af   :  { %1690 = vmatprep.mubr.msk.bf16.mxu1 %vm1838_vm1, %v1837_v15  ;;  %1675 = vmatpush3.bf16.msra.mxu1 %v1757_v63 }
 0x6b0   :  { %1676 = vmatprep.subr.bf16.mxu1 %v1837_v15 }
 0x6b3   :  { %1677 = vmatpush3.bf16.msra.mxu1 %v1758_v27 }
 0x6b4   :  { %1678 = vmatprep.subr.bf16.mxu1 %v1837_v15 }
 0x6b7   :  { %1679 = vmatpush3.bf16.msra.mxu1 %v1759_v28 }
 0x6b8   :  { %1680 = vmatprep.subr.bf16.mxu1 %v1837_v15 }
 0x6bb   :  { %1681 = vmatpush3.bf16.msra.mxu1 %v1760_v29 }
 0x6bc   :  { %1682 = vmatprep.subr.bf16.mxu1 %v1837_v15 }
 0x6bf   :  { %1683 = vmatpush3.bf16.msra.mxu1 %v1761_v30 }
 0x6c0   :  { %1684 = vmatprep.subr.bf16.mxu1 %v1837_v15 }
 0x6c3   :  { %1685 = vmatpush3.bf16.msra.mxu1 %v1762_v31 }
 0x6c4   :  { %1686 = vmatprep.subr.bf16.mxu1 %v1837_v15 }
 0x6c7   :  { %1687 = vmatpush3.bf16.msra.mxu1 %v1763_v32 }
 0x6c8   :  { %1688 = vmatprep.subr.bf16.mxu1 %v1837_v15 }
 0x6cb   :  { %1689 = vmatpush3.bf16.msra.mxu1 %v1764_v33 }
 0x781   :  { %v1191_v48 = vpop.f32.mrb[28].mxu1 }
 0x782   :  { %v1192_v49 = vadd.f32 %v1483_v47, %v1191_v48  ;;  %v1664_v59 = vpop.f32.mrb[29].mxu1 }
 0x783   :  { %v1194_v50 = vpop.f32.mrb[30].mxu1 }
 0x784   :  { %v2181_v51 = vadd.f32 %v1192_v49, %v1927_v0  ;;  %v1195_v54 = vadd.f32 %v1483_v47, %v1194_v50  ;;  %v1665_v55 = vpop.f32.mrb[31].mxu1  ;;  %v1495_v50 = vld [vmem:[%s2275_s13] ss:$0 sm:$0xff] }
 0x786   :  { %v2184_v57 = vadd.f32 %v1195_v54, %v1932_v1  ;;  %v1200_v58 = vsel %vm51_vm0, %v2181_v51, 0.0 }
 0x787   :  { %1201 = vadd.xlane.f32.xlu1 %v1200_v58 }
 0x788   :  { %v1203_v60 = vsel %vm51_vm0, %v2184_v57, 0.0 }
 0x789   :  { %1204 = vadd.xlane.f32.xlu0 %v1203_v60 }
 0x814   :  { %v1202_v61 = vpop.xlane.xlu1 %1201 }
 0x815   :  { %v1206_v62 = vmul.f32 0.03125, %v1202_v61 }
 0x816   :  { %v1205_v2 = vpop.xlane.xlu0 %1204 }
 0x817   :  { %v1208_v4 = vsub.f32 %v2181_v51, %v1206_v62  ;;  %v1207_v0 = vmul.f32 0.03125, %v1205_v2 }
 0x819   :  { %v1209_v5 = vsub.f32 %v2184_v57, %v1207_v0  ;;  %v1210_v6 = vmul.f32 %v1208_v4, %v1208_v4 }
 0x81b   :  { %v1212_v1 = vsel %vm51_vm0, %v1210_v6, 0.0  ;;  %v1211_v8 = vmul.f32 %v1209_v5, %v1209_v5 }
 0x81c   :  { %1213 = vadd.xlane.f32.xlu0 %v1212_v1 }
 0x81d   :  { %v1215_v9 = vsel %vm51_vm0, %v1211_v8, 0.0 }
 0x820   :  { %1216 = vadd.xlane.f32.xlu0 %v1215_v9 }
 0x8a9   :  { %v1214_v12 = vpop.xlane.xlu0 %1213 }
 0x8aa   :  { %v1218_v13 = vmul.f32 0.03125, %v1214_v12 }
 0x8ac   :  { %v1220_v14 = vadd.f32 1e-05, %v1218_v13 }
 0x8ad   :  { %v1217_v56 = vpop.xlane.xlu0 %1216 }
 0x8ae   :  { %1801 = vrsqrt.f32 %v1220_v14  ;;  %v1219_v7 = vmul.f32 0.03125, %v1217_v56 }
 0x8b0   :  { %v1221_v16 = vadd.f32 1e-05, %v1219_v7 }
 0x8b2   :  { %1803 = vrsqrt.f32 %v1221_v16 }
 0x8b8   :  { %v1802_v17 = vpop.eup %1801 }
 0x8b9   :  { %v1224_v18 = vmul.f32 %v1802_v17, %v1208_v4 }
 0x8bb   :  { %v1233_v21 = vmul.f32 %v1487_v19, %v1224_v18 }
 0x8bc   :  { %v1804_v20 = vpop.eup %1803 }
 0x8bd   :  { %v1225_v22 = vmul.f32 %v1804_v20, %v1209_v5  ;;  %v1242_v25 = vadd.f32 %v1488_v23, %v1233_v21 }
 0x8bf   :  { %v1234_v24 = vmul.f32 %v1487_v19, %v1225_v22 }
 0x8c1   :  { %v1243_v26 = vadd.f32 %v1488_v23, %v1234_v24 }
 0x8c3   :  { %v1244_v3 = vpack.c.bf16 %v1243_v26, %v1242_v25 }
 0x8c5   :  { %1671 = vmatmul.mubr.msk.bf16.vlgmr.msra.gmra.mrb[40].mxu0 %vm51_vm0, %v1244_v3 }
 0x998   :  { %v1305_v45 = vpop.f32.mrb[40].mxu0 }
 0x999   :  { %v1306_v53 = vadd.f32 %v1489_v35, %v1305_v45  ;;  %v1672_v46 = vpop.f32.mrb[41].mxu0 }
 0x99a   :  { %v1308_v36 = vpop.f32.mrb[42].mxu0 }
 0x99b   :  { %v1493_v34 = vmul.f32 -1.702, %v1306_v53  ;;  %v1309_v37 = vadd.f32 %v1489_v35, %v1308_v36  ;;  %v1673_v38 = vpop.f32.mrb[43].mxu0 }
 0x99d   :  { %v1316_v39 = vmul.f32 1.442695, %v1493_v34  ;;  %v1494_v40 = vmul.f32 -1.702, %v1309_v37 }
 0x99f   :  { %1805 = vpow2.f32 %v1316_v39  ;;  %v1318_v15 = vmul.f32 1.442695, %v1494_v40 }
 0x9a1   :  { %1807 = vpow2.f32 %v1318_v15 }
 0x9a9   :  { %v1806_v52 = vpop.eup %1805 }
 0x9aa   :  { %v1320_v41 = vadd.f32 1.0, %v1806_v52 }
 0x9ab   :  { %v1808_v42 = vpop.eup %1807 }
 0x9ac   :  { %1809 = vrcp.f32 %v1320_v41  ;;  %v1321_v43 = vadd.f32 1.0, %v1808_v42 }
 0x9ae   :  { %1811 = vrcp.f32 %v1321_v43 }
 0x9b6   :  { %v1810_v44 = vpop.eup %1809 }
 0x9b7   :  { %v1326_v48 = vmul.f32 %v1810_v44, %v1306_v53 }
 0x9b8   :  { %v1812_v47 = vpop.eup %1811 }
 0x9b9   :  { %v1327_v49 = vmul.f32 %v1812_v47, %v1309_v37 }
 0x9bb   :  { %v1328_v59 = vpack.c.bf16 %v1327_v49, %v1326_v48 }
 0x9bd   :  { %1691 = vmatmul.mubr.bf16.vlgmr.msra.gmra.mrb[32].mxu1 %v1328_v59 }
 0xa90   :  { %v1434_v54 = vpop.f32.mrb[32].mxu1 }
 0xa91   :  { %v1435_v55 = vadd.f32 %v1495_v50, %v1434_v54  ;;  %v1692_v58 = vpop.f32.mrb[33].mxu1 }
 0xa92   :  { %v1437_v60 = vpop.f32.mrb[34].mxu1 }
 0xa93   :  { %v1441_v61 = vadd.f32 %v1435_v55, %v2181_v51  ;;  %v1438_v62 = vadd.f32 %v1495_v50, %v1437_v60  ;;  %v1693_v2 = vpop.f32.mrb[35].mxu1 }
 0xa95   :  { %1443 = vst.msk [vmem:[#allocation2] sm:$0xff] %vm51_vm0, %v1441_v61  ;;  %v1442_v4 = vadd.f32 %v1438_v62, %v2184_v57 }
 0xa97   :  { %1444 = vst.msk [vmem:[#allocation2 + $0x8] sm:$0xff] %vm51_vm0, %v1442_v4 }
 0xa98   :  { %1824 = shalt.err (!%p1821_p4)
}
 0xa99   :  { %s1825_s21 = scalar_lea.hbm %s2276_s14, 256 }
 0xa9a   :  { %p1826_p5 = scmp.ne.s32.totalorder %s2276_s14, %s1825_s21  ;;  %p1829_p6 = scmp.lt.u32.totalorder %s1825_s21, %s2276_s14 }
 0xa9c   :  { %p1831_p7 = pnand %p1829_p6, %p1826_p5 }
 0xa9e   :  { %1834 = shalt.err (!%p1831_p7)
}
 0xa9f   :  { %s1848_s2 = smov 128  }
 0xaa0   :  { %1456 = dma.vmem_to_hbm [thread:$0]  %s1451_s19, 256, %s2276_s14, [#allocation3], %s1848_s2, %s1848_s2, %s1844_s28  }
 0xaa1   :  { %1835 = dma.done.wait [#allocation3], 256  }
 0xaa2   :  { %1836 = vsyncadd [#allocation3], 4294967040 }
 0xaa3   :  { %1460 = vsyncpa [#allocation3], 1 }

</bundles_post_ra>
